<compile_context>
chip_gen: v7x
topology: tpu7x:2x2x1
jax: 0.10.0
libtpu: 0.0.40
codegen_flags: <defaults>
</compile_context>

<pallas_src>
import functools

import numpy as np
import jax
import jax.numpy as jnp
from jax.experimental import pallas as pl
from jax.experimental.pallas import tpu as pltpu

NEG_SLOPE = 0.01   # F.leaky_relu default
BN_EPS = 1e-5      # nn.BatchNorm1d default


def _leaky_relu(x):
    return jnp.where(x > 0, x, NEG_SLOPE * x)


def _ceil_to(x, m):
    return ((x + m - 1) // m) * m


# ----------------------------------------------------------------------------
# Pass A: MLP (bf16 fc1/fc2, f32 fc3) + batch-global BatchNorm statistics.
# ----------------------------------------------------------------------------
def _mlp_stats_kernel(x_ref, w1_ref, b1_ref, w2_ref, b2_ref, w3_ref, b3_ref,
                      h_ref, sum_ref, sumsq_ref, *, n_valid):
    i = pl.program_id(0)

    @pl.when(i == 0)
    def _init():
        sum_ref[...] = jnp.zeros_like(sum_ref)
        sumsq_ref[...] = jnp.zeros_like(sumsq_ref)

    # fc1 / fc2: bf16 operands, f32 accumulation (MXU-native path).
    h = jnp.dot(x_ref[...], w1_ref[...], preferred_element_type=jnp.float32)
    h = _leaky_relu(h + b1_ref[...])
    h = jnp.dot(h.astype(jnp.bfloat16), w2_ref[...],
                preferred_element_type=jnp.float32)
    h = _leaky_relu(h + b2_ref[...])
    # fc3 kept in f32 (tiny K/N; keeps the BatchNorm input accurate).
    h = jnp.dot(h, w3_ref[...], preferred_element_type=jnp.float32)
    h = _leaky_relu(h + b3_ref[...])

    h_ref[...] = h

    # Batch-global BN statistics (exclude batch-padding rows from the sums).
    tb, npad = h.shape
    row = jax.lax.broadcasted_iota(jnp.int32, (tb, npad), 0) + i * tb
    hv = jnp.where(row < n_valid, h, 0.0)
    sum_ref[...] += jnp.sum(hv, axis=0, keepdims=True)
    sumsq_ref[...] += jnp.sum(hv * hv, axis=0, keepdims=True)


# ----------------------------------------------------------------------------
# Pass B: BatchNorm folded into one scale/shift FMA + tanh.
# ----------------------------------------------------------------------------
def _bn_tanh_kernel(h_ref, sum_ref, sumsq_ref, gamma_ref, beta_ref, o_ref,
                    *, n_valid):
    inv_n = 1.0 / float(n_valid)
    mean = sum_ref[...] * inv_n
    var = jnp.maximum(sumsq_ref[...] * inv_n - mean * mean, 0.0)
    scale = gamma_ref[...] * jax.lax.rsqrt(var + BN_EPS)
    shift = beta_ref[...] - mean * scale
    o_ref[...] = jnp.tanh(h_ref[...] * scale + shift)


def actor_forward(x, params, *, tb_max=512):
    """Actor forward pass. x: (B, state_size) f32 -> (B, action_size) f32."""
    B, S = x.shape
    H1 = params["w1"].shape[1]
    H2 = params["w2"].shape[1]
    A = params["w3"].shape[1]
    NPAD = _ceil_to(A, 128)            # lane-dense output / fc3 columns

    # Batch tiling: tb_max rows per grid step (multiple of 256 for MXU height,
    # multiple of 16 for bf16 sublanes); small batches collapse to one tile.
    TB = min(tb_max, _ceil_to(B, 8))
    Bpad = _ceil_to(B, TB)
    nb = Bpad // TB

    # --- operand prep (wrapper side) -------------------------------------
    xb = x.astype(jnp.bfloat16)
    if Bpad != B:
        xb = jnp.pad(xb, ((0, Bpad - B), (0, 0)))
    w1 = params["w1"].astype(jnp.bfloat16)
    w2 = params["w2"].astype(jnp.bfloat16)
    b1 = params["b1"].astype(jnp.float32)
    b2 = params["b2"].astype(jnp.float32)
    pad_n = ((0, 0), (0, NPAD - A))
    w3 = jnp.pad(params["w3"].astype(jnp.float32), pad_n)
    b3 = jnp.pad(params["b3"].astype(jnp.float32), pad_n)
    gamma = jnp.pad(params["gamma"].astype(jnp.float32), pad_n)
    beta = jnp.pad(params["beta"].astype(jnp.float32), pad_n)

    def full_spec(shape):
        return pl.BlockSpec(shape, lambda i: (0,) * len(shape))

    row_spec = pl.BlockSpec((TB, NPAD), lambda i: (i, 0))
    vec_spec = pl.BlockSpec((1, NPAD), lambda i: (0, 0))

    weight_bytes = (w1.size * 2 + w2.size * 2
                    + (b1.size + b2.size + w3.size + b3.size
                       + gamma.size + beta.size) * 4)
    tile_bytes = TB * S * 2 + 3 * TB * NPAD * 4 + 6 * NPAD * 4
    vmem_limit = int(min(max(2 * (tile_bytes + weight_bytes) + (2 << 20),
                             16 << 20), 48 << 20))

    # ---------------- pass A: MLP + BN statistics -------------------------
    mlp_kernel = functools.partial(_mlp_stats_kernel, n_valid=B)
    h_full, h_sum, h_sumsq = pl.pallas_call(
        mlp_kernel,
        out_shape=(
            jax.ShapeDtypeStruct((Bpad, NPAD), jnp.float32),
            jax.ShapeDtypeStruct((1, NPAD), jnp.float32),
            jax.ShapeDtypeStruct((1, NPAD), jnp.float32),
        ),
        grid_spec=pltpu.PrefetchScalarGridSpec(
            num_scalar_prefetch=0,
            grid=(nb,),
            in_specs=[
                pl.BlockSpec((TB, S), lambda i: (i, 0)),   # x tile
                full_spec(w1.shape), full_spec(b1.shape),
                full_spec(w2.shape), full_spec(b2.shape),
                full_spec(w3.shape), full_spec(b3.shape),
            ],
            out_specs=(row_spec, vec_spec, vec_spec),
        ),
        # TODO(synk): for v7x megacore, switch to per-core partial sums (CMEM or
        # a tiny extra reduce) so this accumulation axis can be "parallel" too.
        compiler_params=pltpu.CompilerParams(
            dimension_semantics=("arbitrary",),
            vmem_limit_bytes=vmem_limit),
        cost_estimate=pl.CostEstimate(
            flops=int(2 * Bpad * (S * H1 + H1 * H2 + H2 * NPAD)),
            transcendentals=0,
            bytes_accessed=int(Bpad * S * 2 + weight_bytes
                               + Bpad * NPAD * 4 + 2 * NPAD * 4)),
    )(xb, w1, b1, w2, b2, w3, b3)

    # ---------------- pass B: folded BN + tanh -----------------------------
    bn_kernel = functools.partial(_bn_tanh_kernel, n_valid=B)
    y_full = pl.pallas_call(
        bn_kernel,
        out_shape=jax.ShapeDtypeStruct((Bpad, NPAD), jnp.float32),
        grid_spec=pltpu.PrefetchScalarGridSpec(
            num_scalar_prefetch=0,
            grid=(nb,),
            in_specs=[row_spec, vec_spec, vec_spec, vec_spec, vec_spec],
            out_specs=row_spec,
        ),
        compiler_params=pltpu.CompilerParams(
            dimension_semantics=("parallel",),
            vmem_limit_bytes=vmem_limit),
        cost_estimate=pl.CostEstimate(
            flops=int(4 * Bpad * NPAD),
            transcendentals=int(Bpad * NPAD + NPAD),
            bytes_accessed=int(2 * Bpad * NPAD * 4 + 4 * NPAD * 4)),
    )(h_full, h_sum, h_sumsq, gamma, beta)

    return y_full[:B, :A]


def init_actor_params(key, state_size, action_size, fc1_units=64, fc2_units=64):
    """Deterministic init mirroring Actor.__init__ / reset_parameters.

    hidden_init uses weight.size()[0] == out_features, so lim = 1/sqrt(out_features)
    for fc1/fc2 weights; fc3 weights are U(-3e-3, 3e-3).  Linear biases keep the
    PyTorch default U(-1/sqrt(in_features), 1/sqrt(in_features)).  Weights are
    stored transposed as (in_features, out_features).
    """
    keys = jax.random.split(key, 6)

    def u(k, shape, lim):
        return jax.random.uniform(k, shape, jnp.float32, -lim, lim)

    lim1 = 1.0 / np.sqrt(fc1_units)
    lim2 = 1.0 / np.sqrt(fc2_units)
    return {
        "w1": u(keys[0], (state_size, fc1_units), lim1),
        "b1": u(keys[1], (1, fc1_units), 1.0 / np.sqrt(state_size)),
        "w2": u(keys[2], (fc1_units, fc2_units), lim2),
        "b2": u(keys[3], (1, fc2_units), 1.0 / np.sqrt(fc1_units)),
        "w3": u(keys[4], (fc2_units, action_size), 0.003),
        "b3": u(keys[5], (1, action_size), 1.0 / np.sqrt(fc2_units)),
        # BatchNorm1d affine params (default init)
        "gamma": jnp.ones((1, action_size), jnp.float32),
        "beta": jnp.zeros((1, action_size), jnp.float32),
    }


def actor_reference(x, params):
    """Pure-JAX reference with the kernel's precision policy
    (bf16 fc1/fc2 operands with f32 accumulation; fc3 / BN / tanh in f32)."""
    h = _leaky_relu(
        jnp.dot(x.astype(jnp.bfloat16), params["w1"].astype(jnp.bfloat16),
                preferred_element_type=jnp.float32) + params["b1"])
    h = _leaky_relu(
        jnp.dot(h.astype(jnp.bfloat16), params["w2"].astype(jnp.bfloat16),
                preferred_element_type=jnp.float32) + params["b2"])
    h = _leaky_relu(
        jnp.dot(h, params["w3"], preferred_element_type=jnp.float32)
        + params["b3"])
    mean = jnp.mean(h, axis=0, keepdims=True)
    var = jnp.mean(jnp.square(h - mean), axis=0, keepdims=True)
    h = (h - mean) * jax.lax.rsqrt(var + BN_EPS)
    return jnp.tanh(params["gamma"] * h + params["beta"])


if __name__ == "__main__":
    batch, state_size, action_size = 8, 16, 4

    key = jax.random.PRNGKey(0)
    k_param, k_x = jax.random.split(key)
    params = init_actor_params(k_param, state_size, action_size)
    x = jax.random.normal(k_x, (batch, state_size), jnp.float32)

    out = jax.block_until_ready(actor_forward(x, params))
    assert out.shape == (batch, action_size)

    ref = actor_reference(x, params)
    np.testing.assert_allclose(np.asarray(out), np.asarray(ref),
                               rtol=1e-3, atol=1e-3)
    print("KERNEL_OK")
</pallas_src>

<mosaic_0001>
module attributes {stable_mosaic.version = 11 : i64} {
  func.func @_mlp_stats_kernel(%arg0: i32, %arg1: memref<8x16xbf16, #tpu.memory_space<vmem>>, %arg2: memref<16x64xbf16, #tpu.memory_space<vmem>>, %arg3: memref<1x64xf32, #tpu.memory_space<vmem>>, %arg4: memref<64x64xbf16, #tpu.memory_space<vmem>>, %arg5: memref<1x64xf32, #tpu.memory_space<vmem>>, %arg6: memref<64x128xf32, #tpu.memory_space<vmem>>, %arg7: memref<1x128xf32, #tpu.memory_space<vmem>>, %arg8: memref<8x128xf32, #tpu.memory_space<vmem>>, %arg9: memref<1x128xf32, #tpu.memory_space<vmem>>, %arg10: memref<1x128xf32, #tpu.memory_space<vmem>>) attributes {dimension_semantics = [#tpu.dimension_semantics<arbitrary>], iteration_bounds = array<i64: 1>, scalar_prefetch = 0 : i64, scratch_operands = 0 : i64, tpu.core_type = #tpu.core_type<tc>, window_params = [{transform_indices = @transform_0, window_bounds = array<i64: 8, 16>}, {pipeline_mode = #tpu.pipeline_mode<synchronous>, transform_indices = @transform_1, window_bounds = array<i64: 16, 64>}, {pipeline_mode = #tpu.pipeline_mode<synchronous>, transform_indices = @transform_2, window_bounds = array<i64: 1, 64>}, {pipeline_mode = #tpu.pipeline_mode<synchronous>, transform_indices = @transform_3, window_bounds = array<i64: 64, 64>}, {pipeline_mode = #tpu.pipeline_mode<synchronous>, transform_indices = @transform_4, window_bounds = array<i64: 1, 64>}, {pipeline_mode = #tpu.pipeline_mode<synchronous>, transform_indices = @transform_5, window_bounds = array<i64: 64, 128>}, {pipeline_mode = #tpu.pipeline_mode<synchronous>, transform_indices = @transform_6, window_bounds = array<i64: 1, 128>}, {transform_indices = @transform_7, window_bounds = array<i64: 8, 128>}, {pipeline_mode = #tpu.pipeline_mode<synchronous>, transform_indices = @transform_8, window_bounds = array<i64: 1, 128>}, {pipeline_mode = #tpu.pipeline_mode<synchronous>, transform_indices = @transform_9, window_bounds = array<i64: 1, 128>}]} {
    %c0_i32 = arith.constant 0 : i32
    %0 = arith.cmpi eq, %arg0, %c0_i32 : i32
    %1 = arith.extui %0 : i1 to i32
    %c0_i32_0 = arith.constant 0 : i32
    %2 = arith.cmpi ne, %1, %c0_i32_0 : i32
    scf.if %2 {
      %cst_36 = arith.constant 0.000000e+00 : f32
      %55 = vector.broadcast %cst_36 : f32 to vector<1x128xf32>
      %c0_37 = arith.constant 0 : index
      %c0_38 = arith.constant 0 : index
      %56 = vector.load %arg9[%c0_37, %c0_38] : memref<1x128xf32, #tpu.memory_space<vmem>>, vector<1x128xf32>
      tpu.vector_store %arg9[%c0_37, %c0_38], %55 {strides = array<i32>} : memref<1x128xf32, #tpu.memory_space<vmem>>, vector<1x128xf32>,
      %cst_39 = arith.constant 0.000000e+00 : f32
      %57 = vector.broadcast %cst_39 : f32 to vector<1x128xf32>
      %c0_40 = arith.constant 0 : index
      %c0_41 = arith.constant 0 : index
      %58 = vector.load %arg10[%c0_40, %c0_41] : memref<1x128xf32, #tpu.memory_space<vmem>>, vector<1x128xf32>
      tpu.vector_store %arg10[%c0_40, %c0_41], %57 {strides = array<i32>} : memref<1x128xf32, #tpu.memory_space<vmem>>, vector<1x128xf32>,
    } else {
    }
    %c0 = arith.constant 0 : index
    %c0_1 = arith.constant 0 : index
    %3 = vector.load %arg1[%c0, %c0_1] : memref<8x16xbf16, #tpu.memory_space<vmem>>, vector<8x16xbf16>
    %c0_2 = arith.constant 0 : index
    %c0_3 = arith.constant 0 : index
    %4 = vector.load %arg2[%c0_2, %c0_3] : memref<16x64xbf16, #tpu.memory_space<vmem>>, vector<16x64xbf16>
    %cst = arith.constant dense<0.000000e+00> : vector<8x64xf32>
    %5 = tpu.matmul %3, %4, %cst {dimension_numbers = #tpu.dot_dimension_numbers<[1], [0], [0], [1], [0, 0, 1, 1], [], []>} : vector<8x16xbf16>, vector<16x64xbf16>, vector<8x64xf32> -> vector<8x64xf32>
    %c0_4 = arith.constant 0 : index
    %c0_5 = arith.constant 0 : index
    %6 = vector.load %arg3[%c0_4, %c0_5] : memref<1x64xf32, #tpu.memory_space<vmem>>, vector<1x64xf32>
    %7 = vector.broadcast %6 : vector<1x64xf32> to vector<8x64xf32>
    %8 = arith.addf %5, %7 : vector<8x64xf32>
    %cst_6 = arith.constant 0.000000e+00 : f32
    %9 = vector.broadcast %cst_6 : f32 to vector<8x64xf32>
    %10 = arith.cmpf ogt, %8, %9 : vector<8x64xf32>
    %cst_7 = arith.constant 0.00999999977 : f32
    %11 = vector.broadcast %cst_7 : f32 to vector<8x64xf32>
    %12 = arith.mulf %11, %8 : vector<8x64xf32>
    %13 = arith.select %10, %8, %12 : vector<8x64xi1>, vector<8x64xf32>
    %14 = arith.truncf %13 : vector<8x64xf32> to vector<8x64xbf16>
    %c0_8 = arith.constant 0 : index
    %c0_9 = arith.constant 0 : index
    %15 = vector.load %arg4[%c0_8, %c0_9] : memref<64x64xbf16, #tpu.memory_space<vmem>>, vector<64x64xbf16>
    %cst_10 = arith.constant dense<0.000000e+00> : vector<8x64xf32>
    %16 = tpu.matmul %14, %15, %cst_10 {dimension_numbers = #tpu.dot_dimension_numbers<[1], [0], [0], [1], [0, 0, 1, 1], [], []>} : vector<8x64xbf16>, vector<64x64xbf16>, vector<8x64xf32> -> vector<8x64xf32>
    %c0_11 = arith.constant 0 : index
    %c0_12 = arith.constant 0 : index
    %17 = vector.load %arg5[%c0_11, %c0_12] : memref<1x64xf32, #tpu.memory_space<vmem>>, vector<1x64xf32>
    %18 = vector.broadcast %17 : vector<1x64xf32> to vector<8x64xf32>
    %19 = arith.addf %16, %18 : vector<8x64xf32>
    %cst_13 = arith.constant 0.000000e+00 : f32
    %20 = vector.broadcast %cst_13 : f32 to vector<8x64xf32>
    %21 = arith.cmpf ogt, %19, %20 : vector<8x64xf32>
    %cst_14 = arith.constant 0.00999999977 : f32
    %22 = vector.broadcast %cst_14 : f32 to vector<8x64xf32>
    %23 = arith.mulf %22, %19 : vector<8x64xf32>
    %24 = arith.select %21, %19, %23 : vector<8x64xi1>, vector<8x64xf32>
    %c0_15 = arith.constant 0 : index
    %c0_16 = arith.constant 0 : index
    %25 = vector.load %arg6[%c0_15, %c0_16] : memref<64x128xf32, #tpu.memory_space<vmem>>, vector<64x128xf32>
    %cst_17 = arith.constant dense<0.000000e+00> : vector<8x128xf32>
    %26 = tpu.matmul %24, %25, %cst_17 {dimension_numbers = #tpu.dot_dimension_numbers<[1], [0], [0], [1], [0, 0, 1, 1], [], []>} : vector<8x64xf32>, vector<64x128xf32>, vector<8x128xf32> -> vector<8x128xf32>
    %c0_18 = arith.constant 0 : index
    %c0_19 = arith.constant 0 : index
    %27 = vector.load %arg7[%c0_18, %c0_19] : memref<1x128xf32, #tpu.memory_space<vmem>>, vector<1x128xf32>
    %28 = vector.broadcast %27 : vector<1x128xf32> to vector<8x128xf32>
    %29 = arith.addf %26, %28 : vector<8x128xf32>
    %cst_20 = arith.constant 0.000000e+00 : f32
    %30 = vector.broadcast %cst_20 : f32 to vector<8x128xf32>
    %31 = arith.cmpf ogt, %29, %30 : vector<8x128xf32>
    %cst_21 = arith.constant 0.00999999977 : f32
    %32 = vector.broadcast %cst_21 : f32 to vector<8x128xf32>
    %33 = arith.mulf %32, %29 : vector<8x128xf32>
    %34 = arith.select %31, %29, %33 : vector<8x128xi1>, vector<8x128xf32>
    %c0_22 = arith.constant 0 : index
    %c0_23 = arith.constant 0 : index
    %35 = vector.load %arg8[%c0_22, %c0_23] : memref<8x128xf32, #tpu.memory_space<vmem>>, vector<8x128xf32>
    tpu.vector_store %arg8[%c0_22, %c0_23], %34 {strides = array<i32>} : memref<8x128xf32, #tpu.memory_space<vmem>>, vector<8x128xf32>,
    %36 = tpu.iota {dimensions = array<i32: 0>} : vector<8x128xi32>
    %c8_i32 = arith.constant 8 : i32
    %37 = arith.muli %arg0, %c8_i32 : i32
    %38 = vector.broadcast %37 : i32 to vector<8x128xi32>
    %39 = arith.addi %36, %38 : vector<8x128xi32>
    %c8_i32_24 = arith.constant 8 : i32
    %40 = vector.broadcast %c8_i32_24 : i32 to vector<8x128xi32>
    %41 = arith.cmpi slt, %39, %40 : vector<8x128xi32>
    %cst_25 = arith.constant 0.000000e+00 : f32
    %42 = vector.broadcast %cst_25 : f32 to vector<8x128xf32>
    %43 = arith.select %41, %34, %42 : vector<8x128xi1>, vector<8x128xf32>
    %c0_26 = arith.constant 0 : index
    %c0_27 = arith.constant 0 : index
    %44 = vector.load %arg9[%c0_26, %c0_27] : memref<1x128xf32, #tpu.memory_space<vmem>>, vector<1x128xf32>
    %cst_28 = arith.constant dense<0.000000e+00> : vector<128xf32>
    %45 = vector.multi_reduction <add>, %43, %cst_28 [0] : vector<8x128xf32> to vector<128xf32>
    %46 = vector.shape_cast %45 : vector<128xf32> to vector<1x128xf32>
    %47 = arith.addf %44, %46 : vector<1x128xf32>
    %c0_29 = arith.constant 0 : index
    %c0_30 = arith.constant 0 : index
    %48 = vector.load %arg9[%c0_29, %c0_30] : memref<1x128xf32, #tpu.memory_space<vmem>>, vector<1x128xf32>
    tpu.vector_store %arg9[%c0_29, %c0_30], %47 {strides = array<i32>} : memref<1x128xf32, #tpu.memory_space<vmem>>, vector<1x128xf32>,
    %c0_31 = arith.constant 0 : index
    %c0_32 = arith.constant 0 : index
    %49 = vector.load %arg10[%c0_31, %c0_32] : memref<1x128xf32, #tpu.memory_space<vmem>>, vector<1x128xf32>
    %50 = arith.mulf %43, %43 : vector<8x128xf32>
    %cst_33 = arith.constant dense<0.000000e+00> : vector<128xf32>
    %51 = vector.multi_reduction <add>, %50, %cst_33 [0] : vector<8x128xf32> to vector<128xf32>
    %52 = vector.shape_cast %51 : vector<128xf32> to vector<1x128xf32>
    %53 = arith.addf %49, %52 : vector<1x128xf32>
    %c0_34 = arith.constant 0 : index
    %c0_35 = arith.constant 0 : index
    %54 = vector.load %arg10[%c0_34, %c0_35] : memref<1x128xf32, #tpu.memory_space<vmem>>, vector<1x128xf32>
    tpu.vector_store %arg10[%c0_34, %c0_35], %53 {strides = array<i32>} : memref<1x128xf32, #tpu.memory_space<vmem>>, vector<1x128xf32>,
    return
  }
  func.func @transform_0(%arg0: i32) -> (i32, i32) {
    %c0_i32 = arith.constant 0 : i32
    %c0_i32_0 = arith.constant 0 : i32
    return %arg0, %c0_i32 : i32, i32
  }
  func.func @transform_1(%arg0: i32) -> (i32, i32) {
    %c0_i32 = arith.constant 0 : i32
    %c0_i32_0 = arith.constant 0 : i32
    %c0_i32_1 = arith.constant 0 : i32
    return %c0_i32, %c0_i32_0 : i32, i32
  }
  func.func @transform_2(%arg0: i32) -> (i32, i32) {
    %c0_i32 = arith.constant 0 : i32
    %c0_i32_0 = arith.constant 0 : i32
    %c0_i32_1 = arith.constant 0 : i32
    return %c0_i32, %c0_i32_0 : i32, i32
  }
  func.func @transform_3(%arg0: i32) -> (i32, i32) {
    %c0_i32 = arith.constant 0 : i32
    %c0_i32_0 = arith.constant 0 : i32
    %c0_i32_1 = arith.constant 0 : i32
    return %c0_i32, %c0_i32_0 : i32, i32
  }
  func.func @transform_4(%arg0: i32) -> (i32, i32) {
    %c0_i32 = arith.constant 0 : i32
    %c0_i32_0 = arith.constant 0 : i32
    %c0_i32_1 = arith.constant 0 : i32
    return %c0_i32, %c0_i32_0 : i32, i32
  }
  func.func @transform_5(%arg0: i32) -> (i32, i32) {
    %c0_i32 = arith.constant 0 : i32
    %c0_i32_0 = arith.constant 0 : i32
    %c0_i32_1 = arith.constant 0 : i32
    return %c0_i32, %c0_i32_0 : i32, i32
  }
  func.func @transform_6(%arg0: i32) -> (i32, i32) {
    %c0_i32 = arith.constant 0 : i32
    %c0_i32_0 = arith.constant 0 : i32
    %c0_i32_1 = arith.constant 0 : i32
    return %c0_i32, %c0_i32_0 : i32, i32
  }
  func.func @transform_7(%arg0: i32) -> (i32, i32) {
    %c0_i32 = arith.constant 0 : i32
    %c0_i32_0 = arith.constant 0 : i32
    return %arg0, %c0_i32 : i32, i32
  }
  func.func @transform_8(%arg0: i32) -> (i32, i32) {
    %c0_i32 = arith.constant 0 : i32
    %c0_i32_0 = arith.constant 0 : i32
    %c0_i32_1 = arith.constant 0 : i32
    return %c0_i32, %c0_i32_0 : i32, i32
  }
  func.func @transform_9(%arg0: i32) -> (i32, i32) {
    %c0_i32 = arith.constant 0 : i32
    %c0_i32_0 = arith.constant 0 : i32
    %c0_i32_1 = arith.constant 0 : i32
    return %c0_i32, %c0_i32_0 : i32, i32
  }
}

</mosaic_0001>

<bundles_post_ra>
// kernel: tpu_custom_call.1
= control target key start
LH: loop header
LB: loop body
LE: loop exit
PB: predicated region body
PF: predicated region fallthrough
CT: control target
= control target key end

     0   :  { %15 = vsyncpa [#allocation3], 0  ;;  %s835_s0 = inlined_call_operand.hbm [shape: bf16[8,16], index: 0, kind: input, shape index: {}]   ;;  %s836_s1 = inlined_call_operand.hbm [shape: bf16[16,64], index: 1, kind: input, shape index: {}]   ;;  %s837_s2 = inlined_call_operand.vmem [shape: f32[1,64], index: 2, kind: input, shape index: {}]   ;;  %s838_s3 = inlined_call_operand.hbm [shape: bf16[64,64], index: 3, kind: input, shape index: {}]   ;;  %s839_s4 = inlined_call_operand.vmem [shape: f32[1,64], index: 4, kind: input, shape index: {}]   ;;  %s840_s5 = inlined_call_operand.hbm [shape: f32[64,128], index: 5, kind: input, shape index: {}]   ;;  %s841_s6 = inlined_call_operand.vmem [shape: f32[1,128], index: 6, kind: input, shape index: {}]   ;;  %s842_s7 = inlined_call_operand.hbm [shape: f32[8,128], index: 7, kind: output, shape index: {0}]   ;;  %s843_s8 = inlined_call_operand.hbm [shape: f32[1,128], index: 8, kind: output, shape index: {1}]   ;;  %s844_s9 = inlined_call_operand.hbm [shape: f32[1,128], index: 9, kind: output, shape index: {2}]  }
   0x1   :  { %16 = vsyncpa [#allocation6], 0 }
   0x2   :  { %17 = vsyncpa [#allocation9], 0 }
   0x3   :  { %18 = vsyncpa [#allocation4], 0 }
   0x4   :  { %19 = vsyncpa [#allocation12], 0  ;;  %s662_s30 = smov [#allocation5]   ;;  %s498_s13 = scalar_lea.hbm %s836_s1, 128 }
   0x5   :  { %s35_s10 = sshll.u32 %s662_s30, 4  ;;  %p499_p0 = scmp.ne.s32.totalorder %s836_s1, %s498_s13  ;;  %s36_s10 = int_to_ptr.vmem [resolvable:$true] %s35_s10 }
   0x6   :  { %p502_p1 = scmp.lt.u32.totalorder %s498_s13, %s836_s1 }
   0x8   :  { %p504_p2 = pnand %p502_p1, %p499_p0 }
   0xa   :  { %507 = shalt.err (!%p504_p2)
}
   0xb   :  { %s508_s18 = scalar_lea.vmem %s36_s10, 128  ;;  %p513_p4 = scmp.lt.s32.totalorder %s36_s10, %s36_s10 }
   0xc   :  { %p509_p3 = scmp.ne.s32.totalorder %s36_s10, %s508_s18  ;;  %p514_p5 = scmp.lt.s32.totalorder %s508_s18, %s508_s18 }
   0xe   :  { %p515_p6 = por %p514_p5, %p513_p4 }
  0x10   :  { %p516_p7 = pnand %p515_p6, %p509_p3 }
  0x12   :  { %519 = shalt.err (!%p516_p7)
}
  0x13   :  { %s663_s19 = smov 64   ;;  %s664_s20 = smov 4  }
  0x14   :  { %41 = dma.hbm_to_vmem [thread:$0]  %s836_s1, 128, %s36_s10, [#allocation6], %s663_s19, %s663_s19, %s664_s20  }
  0x15   :  { %s665_s23 = smov [#allocation2]   ;;  %s666_s25 = smov [#allocation7]  }
  0x16   :  { %s26_s24 = sshll.u32 %s665_s23, 4  ;;  %s49_s26 = sshll.u32 %s666_s25, 4  ;;  %s27_s24 = int_to_ptr.vmem [resolvable:$true] %s26_s24  ;;  %s50_s26 = int_to_ptr.vmem [resolvable:$true] %s49_s26 }
  0x17   :  { %s520_s29 = scalar_lea.hbm %s835_s0, 64 }
  0x18   :  { %p521_p8 = scmp.ne.s32.totalorder %s835_s0, %s520_s29  ;;  %p524_p9 = scmp.lt.u32.totalorder %s520_s29, %s835_s0 }
  0x1a   :  { %p526_p10 = pnand %p524_p9, %p521_p8 }
  0x1c   :  { %529 = shalt.err (!%p526_p10)
}
  0x1d   :  { %s530_s1 = scalar_lea.vmem %s27_s24, 64  ;;  %p535_p12 = scmp.lt.s32.totalorder %s27_s24, %s27_s24 }
  0x1e   :  { %p531_p11 = scmp.ne.s32.totalorder %s27_s24, %s530_s1  ;;  %p536_p13 = scmp.lt.s32.totalorder %s530_s1, %s530_s1 }
  0x20   :  { %p537_p0 = por %p536_p13, %p535_p12 }
  0x22   :  { %p538_p1 = pnand %p537_p0, %p531_p11 }
  0x24   :  { %541 = shalt.err (!%p538_p1)
}
  0x25   :  { %29 = dma.hbm_to_vmem [thread:$0]  %s835_s0, 64, %s27_s24, [#allocation3]  }
  0x26   :  { %s542_s17 = scalar_lea.hbm %s838_s3, 512 }
  0x27   :  { %p543_p2 = scmp.ne.s32.totalorder %s838_s3, %s542_s17  ;;  %p546_p3 = scmp.lt.u32.totalorder %s542_s17, %s838_s3 }
  0x29   :  { %p548_p4 = pnand %p546_p3, %p543_p2 }
  0x2b   :  { %551 = shalt.err (!%p548_p4)
}
  0x2c   :  { %s552_s25 = scalar_lea.vmem %s50_s26, 512  ;;  %p557_p6 = scmp.lt.s32.totalorder %s50_s26, %s50_s26 }
  0x2d   :  { %p553_p5 = scmp.ne.s32.totalorder %s50_s26, %s552_s25  ;;  %p558_p7 = scmp.lt.s32.totalorder %s552_s25, %s552_s25 }
  0x2f   :  { %p559_p8 = por %p558_p7, %p557_p6 }
  0x31   :  { %p560_p9 = pnand %p559_p8, %p553_p5 }
  0x33   :  { %563 = shalt.err (!%p560_p9)
}
  0x34   :  { %55 = dma.hbm_to_vmem [thread:$0]  %s838_s3, 512, %s50_s26, [#allocation6], %s663_s19, %s663_s19, %s664_s20  }
  0x35   :  { %s667_s27 = smov [#allocation8]   ;;  %s564_s11 = scalar_lea.hbm %s840_s5, 1024 }
  0x36   :  { %s63_s28 = sshll.u32 %s667_s27, 4  ;;  %p565_p10 = scmp.ne.s32.totalorder %s840_s5, %s564_s11  ;;  %s64_s28 = int_to_ptr.vmem [resolvable:$true] %s63_s28 }
  0x37   :  { %p568_p11 = scmp.lt.u32.totalorder %s564_s11, %s840_s5 }
  0x39   :  { %p570_p12 = pnand %p568_p11, %p565_p10 }
  0x3b   :  { %573 = shalt.err (!%p570_p12)
}
  0x3c   :  { %s574_s14 = scalar_lea.vmem %s64_s28, 1024  ;;  %p579_p0 = scmp.lt.s32.totalorder %s64_s28, %s64_s28 }
  0x3d   :  { %p575_p13 = scmp.ne.s32.totalorder %s64_s28, %s574_s14  ;;  %p580_p1 = scmp.lt.s32.totalorder %s574_s14, %s574_s14 }
  0x3f   :  { %p581_p2 = por %p580_p1, %p579_p0 }
  0x41   :  { %p582_p3 = pnand %p581_p2, %p575_p13 }
  0x43   :  { %585 = shalt.err (!%p582_p3)
}
  0x44   :  { %s668_s3 = smov 128   ;;  %s669_s19 = smov 8  }
  0x45   :  { %69 = dma.hbm_to_vmem [thread:$0]  %s840_s5, 1024, %s64_s28, [#allocation9], %s668_s3, %s668_s3, %s669_s19  }
  0x46   :  { %652 = dma.done.wait [#allocation3], 64  }
  0x47   :  { %653 = vsyncadd [#allocation3], 4294967232 }
  0x48   :  { %654 = dma.done.wait [#allocation6], 640  }
  0x49   :  { %655 = vsyncadd [#allocation6], 4294966656 }
  0x4a   :  { %656 = dma.done.wait [#allocation9], 1024  }
  0x4b   :  { %657 = vsyncadd [#allocation9], 4294966272  ;;  %v670_v0 = vmov 0.0   ;;  %vm671_vm0 = vmmov 0   ;;  %v493_v1 = vld [vmem:[#allocation5] sm:$0xff]   ;;  %vm107_vm1 = vcmask 130048  }
  0x4c   :  { %430 = vmatprep.subr.bf16.mxu0 %v670_v0  ;;  %89 = vst [vmem:[#allocation11] sm:$0x1] %v670_v0  ;;  %90 = vst [vmem:[#allocation13] sm:$0x1] %v670_v0  ;;  %432 = vmatprep.mubr.msk.bf16.mxu0 %vm671_vm0, %v670_v0  ;;  %v91_v2 = vld [vmem:[#allocation2] sm:$0xf] }
  0x4d   :  { %436 = vmatprep.subr.bf16.mxu1 %v670_v0  ;;  %444 = vmatprep.mubr.msk.bf16.mxu1 %vm671_vm0, %v670_v0  ;;  %v494_v3 = vld [vmem:[#allocation7] sm:$0xff]   ;;  %v495_v4 = vld [vmem:[#allocation7 + $0x8] sm:$0xff]   ;;  %v496_v5 = vld [vmem:[#allocation7 + $0x10] sm:$0xff]   ;;  %v672_v10 = vmov 0.0|0.0   ;;  %vm194_vm3 = vcmask 523264   ;;  %s673_s21 = smov [#allocation10]  }
  0x4e   :  { %431 = vmatpush3.bf16.msra.mxu0 %v493_v1  ;;  %437 = vmatpush3.bf16.msra.mxu1 %v494_v3  ;;  %v497_v6 = vld [vmem:[#allocation7 + $0x18] sm:$0xff]   ;;  %v241_v7 = vld [vmem:[#allocation8] sm:$0xff]  ;;  %v242_v8 = vld [vmem:[#allocation8 + $0x8] sm:$0xff]  ;;  %s365_s22 = sshll.u32 %s673_s21, 4  ;;  %s366_s22 = int_to_ptr.vmem [resolvable:$true] %s365_s22 }
  0x4f   :  { %438 = vmatprep.subr.bf16.mxu1 %v670_v0  ;;  %v243_v9 = vld [vmem:[#allocation8 + $0x10] sm:$0xff]  ;;  %467 = vmatprep.subr.bf16.mxu0 %v672_v10  ;;  %v468_v11 = vpack.c.bf16 %v242_v8, %v241_v7  ;;  %v244_v12 = vld [vmem:[#allocation8 + $0x18] sm:$0xff]  ;;  %v245_v14 = vld [vmem:[#allocation8 + $0x20] sm:$0xff]  ;;  %p591_p5 = scmp.lt.s32.totalorder %s366_s22, %s366_s22 }
  0x50   :  { %v471_v13 = vpack.c.bf16 %v244_v12, %v243_v9  ;;  %v246_v15 = vld [vmem:[#allocation8 + $0x28] sm:$0xff]  ;;  %v403_v17 = vld [vmem:[%s837_s2] ss:$0 sm:$0xff]  ;;  %v248_v27 = vld [vmem:[#allocation8 + $0x38] sm:$0xff] }
  0x51   :  { %433 = vmatmul.mubr.msk.bf16.vlgmr.msra.gmra.mrb[0].mxu0 %vm107_vm1, %v91_v2  ;;  %v474_v16 = vpack.c.bf16 %v246_v15, %v245_v14  ;;  %v247_v26 = vld [vmem:[#allocation8 + $0x30] sm:$0xff] }
  0x52   :  { %464 = vmatprep.mubr.msk.f32.mxu0 %vm671_vm0, %v670_v0  ;;  %439 = vmatpush3.bf16.msra.mxu1 %v495_v4  ;;  %v477_v28 = vpack.c.bf16 %v248_v27, %v247_v26  ;;  %v406_v29 = vld [vmem:[%s839_s4] ss:$0 sm:$0xff]  ;;  %s586_s4 = scalar_lea.vmem %s366_s22, 128 }
  0x53   :  { %440 = vmatprep.subr.bf16.mxu1 %v670_v0  ;;  %469 = vmatpush3.bf16.msra.mxu0 %v468_v11  ;;  %v412_v37 = vld [vmem:[%s841_s6] ss:$0 sm:$0xff]  ;;  %p587_p4 = scmp.ne.s32.totalorder %s366_s22, %s586_s4  ;;  %p592_p6 = scmp.lt.s32.totalorder %s586_s4, %s586_s4 }
  0x54   :  { %470 = vmatprep.subr.bf16.mxu0 %v672_v10 }
  0x55   :  { %p593_p7 = por %p592_p6, %p591_p5 }
  0x56   :  { %441 = vmatpush3.bf16.msra.mxu1 %v496_v5 }
  0x57   :  { %442 = vmatprep.subr.bf16.mxu1 %v670_v0  ;;  %472 = vmatpush3.bf16.msra.mxu0 %v471_v13  ;;  %p594_p8 = pnand %p593_p7, %p587_p4 }
  0x58   :  { %473 = vmatprep.subr.bf16.mxu0 %v672_v10 }
  0x5a   :  { %443 = vmatpush3.bf16.msra.mxu1 %v497_v6 }
  0x5b   :  { %475 = vmatpush3.bf16.msra.mxu0 %v474_v16 }
  0x5c   :  { %476 = vmatprep.subr.bf16.mxu0 %v672_v10 }
  0x5f   :  { %478 = vmatpush3.bf16.msra.mxu0 %v477_v28 }
 0x124   :  { %v145_v18 = vpop.f32.mrb[0].mxu0 }
 0x125   :  { %v146_v19 = vadd.f32 %v403_v17, %v145_v18  ;;  %v434_v20 = vpop.f32.mrb[1].mxu0 }
 0x126   :  { %v148_v21 = vpop.f32.mrb[2].mxu0 }
 0x127   :  { %vm151_vm2 = vcmp.gt.f32.partialorder %v146_v19, 0.0  ;;  %v152_v22 = vmul.f32 0.01, %v146_v19  ;;  %v435_v23 = vpop.f32.mrb[3].mxu0 }
 0x129   :  { %v153_v24 = vsel %vm151_vm2, %v146_v19, %v152_v22 }
 0x12a   :  { %v154_v25 = vpack.c.bf16 %v153_v24, %v153_v24 }
 0x12c   :  { %445 = vmatmul.mubr.msk.bf16.vlgmr.msra.gmra.mrb[0].mxu1 %vm194_vm3, %v154_v25 }
 0x1ff   :  { %v232_v30 = vpop.f32.mrb[0].mxu1 }
 0x200   :  { %v233_v31 = vadd.f32 %v406_v29, %v232_v30  ;;  %v446_v32 = vpop.f32.mrb[1].mxu1 }
 0x201   :  { %v235_v33 = vpop.f32.mrb[2].mxu1 }
 0x202   :  { %vm238_vm4 = vcmp.gt.f32.partialorder %v233_v31, 0.0  ;;  %v239_v34 = vmul.f32 0.01, %v233_v31  ;;  %v447_v35 = vpop.f32.mrb[3].mxu1 }
 0x204   :  { %v240_v36 = vsel %vm238_vm4, %v233_v31, %v239_v34 }
 0x205   :  { %465 = vmatmul.mubr.msk.f32.vlgmr.msra.gmra.mrb[4].mxu0 %vm194_vm3, %v240_v36 }
 0x2d8   :  { %v325_v38 = vpop.f32.mrb[4].mxu0 }
 0x2d9   :  { %v326_v39 = vadd.f32 %v412_v37, %v325_v38  ;;  %v466_v40 = vpop.f32.mrb[5].mxu0 }
 0x2db   :  { %vm329_vm5 = vcmp.gt.f32.partialorder %v326_v39, 0.0  ;;  %v330_v41 = vmul.f32 0.01, %v326_v39 }
 0x2dd   :  { %v331_v42 = vsel %vm329_vm5, %v326_v39, %v330_v41 }
 0x2de   :  { %v341_v43 = vrot.slane %v331_v42, 4  ;;  %v350_v44 = vmul.f32 %v331_v42, %v331_v42  ;;  %332 = vst [vmem:[#allocation10] sm:$0xff] %v331_v42 }
 0x2df   :  { %597 = shalt.err (!%p594_p8)
}
 0x2e0   :  { %s598_s25 = scalar_lea.hbm %s842_s7, 128 }
 0x2e1   :  { %p599_p9 = scmp.ne.s32.totalorder %s842_s7, %s598_s25  ;;  %p602_p10 = scmp.lt.u32.totalorder %s598_s25, %s842_s7 }
 0x2e3   :  { %p604_p11 = pnand %p602_p10, %p599_p9 }
 0x2e5   :  { %607 = shalt.err (!%p604_p11)
}
 0x2e6   :  { %368 = dma.vmem_to_hbm [thread:$0]  %s366_s22, 128, %s842_s7, [#allocation4]   ;;  %v342_v45 = vadd.f32 %v341_v43, %v331_v42  ;;  %v351_v46 = vrot.slane %v350_v44, 4  ;;  %v340_v53 = vld [vmem:[#allocation11] sm:$0x1] }
 0x2e7   :  { %s674_s11 = smov [#allocation11]   ;;  %v349_v56 = vld [vmem:[#allocation13] sm:$0x1]  ;;  %s675_s13 = smov [#allocation13]  }
 0x2e8   :  { %v343_v47 = vrot.slane %v342_v45, 2  ;;  %v352_v48 = vadd.f32 %v351_v46, %v350_v44  ;;  %s375_s12 = sshll.u32 %s674_s11, 4  ;;  %s385_s1 = sshll.u32 %s675_s13, 4  ;;  %s376_s12 = int_to_ptr.vmem [resolvable:$true] %s375_s12  ;;  %s803_s1 = int_to_ptr.vmem [resolvable:$true] %s385_s1 }
 0x2e9   :  { %s608_s7 = scalar_lea.vmem %s376_s12, 16  ;;  %s612_s10 = scalar_lea.vmem %s376_s12, 32 }
 0x2ea   :  { %v353_v49 = vrot.slane %v352_v48, 2  ;;  %v344_v50 = vadd.f32 %v343_v47, %v342_v45  ;;  %p609_p12 = scmp.ne.s32.totalorder %s376_s12, %s608_s7  ;;  %p613_p13 = scmp.lt.s32.totalorder %s376_s12, %s376_s12 }
 0x2eb   :  { %p614_p0 = scmp.lt.s32.totalorder %s612_s10, %s608_s7 }
 0x2ec   :  { %v345_v51 = vrot.slane %v344_v50, 1  ;;  %v354_v52 = vadd.f32 %v353_v49, %v352_v48 }
 0x2ed   :  { %p615_p1 = por %p614_p0, %p613_p13 }
 0x2ee   :  { %v346_v54 = vadd.f32 %v345_v51, %v344_v50  ;;  %v355_v55 = vrot.slane %v354_v52, 1 }
 0x2ef   :  { %p616_p2 = pnand %p615_p1, %p609_p12 }
 0x2f0   :  { %v347_v57 = vadd.f32 %v346_v54, %v340_v53  ;;  %v356_v58 = vadd.f32 %v355_v55, %v354_v52 }
 0x2f2   :  { %348 = vst [vmem:[#allocation11] sm:$0x1] %v347_v57  ;;  %v357_v59 = vadd.f32 %v356_v58, %v349_v56 }
 0x2f3   :  { %619 = shalt.err (!%p616_p2)
}
 0x2f4   :  { %s620_s19 = scalar_lea.hbm %s843_s8, 16 }
 0x2f5   :  { %p621_p3 = scmp.ne.s32.totalorder %s843_s8, %s620_s19  ;;  %p624_p4 = scmp.lt.u32.totalorder %s620_s19, %s843_s8 }
 0x2f7   :  { %p626_p5 = pnand %p624_p4, %p621_p3 }
 0x2f9   :  { %629 = shalt.err (!%p626_p5)
}
 0x2fa   :  { %378 = dma.vmem_to_hbm [thread:$0]  %s376_s12, 16, %s843_s8, [#allocation12]   ;;  %358 = vst [vmem:[#allocation13] sm:$0x1] %v357_v59 }
 0x2fb   :  { %s630_s2 = scalar_lea.vmem %s803_s1, 16  ;;  %s634_s18 = scalar_lea.vmem %s803_s1, 32 }
 0x2fc   :  { %p631_p6 = scmp.ne.s32.totalorder %s803_s1, %s630_s2  ;;  %p635_p7 = scmp.lt.s32.totalorder %s803_s1, %s803_s1 }
 0x2fd   :  { %p636_p8 = scmp.lt.s32.totalorder %s634_s18, %s630_s2 }
 0x2ff   :  { %p637_p9 = por %p636_p8, %p635_p7 }
 0x301   :  { %p638_p10 = pnand %p637_p9, %p631_p6 }
 0x303   :  { %641 = shalt.err (!%p638_p10)
}
 0x304   :  { %s642_s4 = scalar_lea.hbm %s844_s9, 16 }
 0x305   :  { %p643_p11 = scmp.ne.s32.totalorder %s844_s9, %s642_s4  ;;  %p646_p12 = scmp.lt.u32.totalorder %s642_s4, %s844_s9 }
 0x307   :  { %p648_p13 = pnand %p646_p12, %p643_p11 }
 0x309   :  { %651 = shalt.err (!%p648_p13)
}
 0x30a   :  { %388 = dma.vmem_to_hbm [thread:$0]  %s803_s1, 16, %s844_s9, [#allocation12]  }
 0x30b   :  { %658 = dma.done.wait [#allocation4], 128  }
 0x30c   :  { %659 = vsyncadd [#allocation4], 4294967168 }
 0x30d   :  { %660 = dma.done.wait [#allocation12], 32  }
 0x30e   :  { %661 = vsyncadd [#allocation12], 4294967264 }
 0x30f   :  { %398 = vsyncpa [#allocation3], 1 }
 0x310   :  { %399 = vsyncpa [#allocation6], 1 }
 0x311   :  { %400 = vsyncpa [#allocation9], 1 }
 0x312   :  { %401 = vsyncpa [#allocation4], 1 }
 0x313   :  { %402 = vsyncpa [#allocation12], 1 }

</bundles_post_ra>
